<compile_context>
chip_gen: v5e
topology: v5e:2x2
jax: 0.10.0
libtpu: 0.0.40
codegen_flags: <defaults>
</compile_context>

<pallas_src>
import functools
import math

import jax
import jax.numpy as jnp
from jax.experimental import pallas as pl
from jax.experimental.pallas import tpu as pltpu


def _gelu_exact(x):
    # PyTorch nn.GELU default ("none" approximation): 0.5*x*(1+erf(x/sqrt(2)))
    return 0.5 * x * (1.0 + jax.lax.erf(x * (1.0 / math.sqrt(2.0))))


def _round_up(x, m):
    return ((x + m - 1) // m) * m


def _physical_vmem_bytes():
    # ~64 MiB/TC on v7x, 128 MiB on v5e/v6e; fall back to the conservative one.
    try:
        info = pltpu.get_tpu_info()
        for attr in ("vmem_capacity_bytes", "vmem_bytes", "vmem_size_bytes"):
            v = getattr(info, attr, None)
            if v:
                return int(v)
    except Exception:
        pass
    return 64 * 1024 * 1024


def mlp_kernel_resident(x_ref, w1_ref, b1_ref, w2_ref, b2_ref, o_ref):
    # Full fc1/fc2 weights resident in VMEM (constant block index); one row
    # tile per grid step, no accumulator scratch.
    x = x_ref[...].astype(w1_ref.dtype)          # in-kernel cast -> bf16 MXU operands
    h = jnp.dot(x, w1_ref[...], preferred_element_type=jnp.float32)
    h = _gelu_exact(h + b1_ref[...].astype(jnp.float32))
    # drop1: p = 0.0 -> identity.
    y = jnp.dot(h.astype(w2_ref.dtype), w2_ref[...],
                preferred_element_type=jnp.float32)
    # drop2: p = 0.0 -> identity.
    o_ref[...] = (y + b2_ref[...].astype(jnp.float32)).astype(o_ref.dtype)


def mlp_kernel_chunked(x_ref, w1_ref, b1_ref, w2_ref, b2_ref, o_ref, acc_ref):
    # Fallback for MLPs too wide for resident weights: hidden dim chunked as a
    # trailing "arbitrary" reduction axis, fc2 partial sums into an f32 scratch.
    k = pl.program_id(1)

    @pl.when(k == 0)
    def _init():
        # Fold the fc2 bias into the accumulator init (added exactly once).
        acc_ref[...] = jnp.broadcast_to(
            b2_ref[...].astype(jnp.float32), acc_ref.shape)

    x = x_ref[...].astype(w1_ref.dtype)
    h = jnp.dot(x, w1_ref[...], preferred_element_type=jnp.float32)
    h = _gelu_exact(h + b1_ref[...].astype(jnp.float32))
    # drop1: p = 0.0 -> identity.
    acc_ref[...] += jnp.dot(h.astype(w2_ref.dtype), w2_ref[...],
                            preferred_element_type=jnp.float32)

    @pl.when(k == pl.num_programs(1) - 1)
    def _finalize():
        # drop2: p = 0.0 -> identity.
        o_ref[...] = acc_ref[...].astype(o_ref.dtype)


@functools.partial(jax.jit, static_argnames=("tm", "hk", "compute_dtype"))
def mlp_block(x, w1, b1, w2, b2, *, tm=512, hk=None,
              compute_dtype=jnp.bfloat16):
    """x: (B, N, in_chs) -> (B, N, out_chs). Weights stored as (in, out)."""
    B, N, in_chs = x.shape
    hidden = w1.shape[1]
    out_chs = w2.shape[1]
    M = B * N
    out_dtype = x.dtype
    x_item = jnp.dtype(x.dtype).itemsize
    o_item = jnp.dtype(out_dtype).itemsize
    c_item = jnp.dtype(compute_dtype).itemsize

    phys_vmem = _physical_vmem_bytes()
    budget = (phys_vmem * 3) // 4            # tile-sizing budget (Mosaic headroom)

    # --- hidden-dim chunking decision --------------------------------------
    w_full_bytes = (in_chs * hidden + hidden * out_chs
                    + hidden + out_chs) * c_item
    if hk is None:
        if w_full_bytes <= budget // 2:
            hk = hidden                                       # fully resident
        else:
            per_col = 2 * (in_chs + out_chs + 1) * c_item     # double-buffered
            hk = max(128, ((budget // 2) // per_col) // 128 * 128)
    else:
        hk = hidden if hk >= hidden else max(128, (hk // 128) * 128)
    resident = hk >= hidden
    if resident:
        hk = hidden
        H_pad = hidden
        n_chunks = 1
    else:
        H_pad = _round_up(hidden, hk)
        n_chunks = H_pad // hk

    # --- row tile: >= 2 tiles for megacore, shrink to fit the VMEM budget ---
    tm = max(8, min(tm, _round_up(max(pl.cdiv(M, 2), 1), 8)))

    def vmem_est(tm_):
        x_b = 2 * tm_ * in_chs * x_item            # double-buffered x tiles
        o_b = 2 * tm_ * out_chs * o_item           # double-buffered out tiles
        acc_b = tm_ * out_chs * 4                  # f32 accumulator / result
        h_b = 2 * tm_ * hk * 4                     # f32 GELU intermediate
        if resident:
            w_b = w_full_bytes
        else:
            w_b = 2 * (in_chs * hk + hk * out_chs + hk) * c_item + out_chs * 4
        return x_b + o_b + acc_b + h_b + w_b

    while tm > 8 and vmem_est(tm) > budget:
        tm = max(8, _round_up(tm // 2, 8))

    vmem_limit = int(min((phys_vmem * 17) // 20,   # ~85% of physical
                         max(2 * vmem_est(tm), 32 * 1024 * 1024)))

    n_row_tiles = pl.cdiv(M, tm)

    # Advisory cost for XLA's scheduler (true weight traffic).
    w_reads = 1 if resident else n_row_tiles
    cost = pl.CostEstimate(
        flops=2 * M * in_chs * hidden + 2 * M * hidden * out_chs,
        transcendentals=M * hidden,
        bytes_accessed=int(M * in_chs * x_item + M * out_chs * o_item
                           + w_reads * (in_chs * H_pad + H_pad * out_chs) * c_item
                           + (H_pad + out_chs) * 4),
    )

    x2d = x.reshape(M, in_chs)                     # metadata-only reshape
    w1c = w1.astype(compute_dtype)
    w2c = w2.astype(compute_dtype)
    b1r = b1.reshape(1, hidden)
    b2r = b2.reshape(1, out_chs)

    if resident:
        out = pl.pallas_call(
            mlp_kernel_resident,
            out_shape=jax.ShapeDtypeStruct((M, out_chs), out_dtype),
            grid_spec=pltpu.PrefetchScalarGridSpec(
                num_scalar_prefetch=0,
                grid=(n_row_tiles,),
                in_specs=[
                    pl.BlockSpec((tm, in_chs), lambda i: (i, 0)),
                    pl.BlockSpec((in_chs, hidden), lambda i: (0, 0)),
                    pl.BlockSpec((1, hidden), lambda i: (0, 0)),
                    pl.BlockSpec((hidden, out_chs), lambda i: (0, 0)),
                    pl.BlockSpec((1, out_chs), lambda i: (0, 0)),
                ],
                out_specs=pl.BlockSpec((tm, out_chs), lambda i: (i, 0)),
            ),
            compiler_params=pltpu.CompilerParams(
                dimension_semantics=("parallel",),
                vmem_limit_bytes=vmem_limit,
            ),
            cost_estimate=cost,
        )(x2d, w1c, b1r, w2c, b2r)
    else:
        # One-time, cheap zero padding of the (small) weights along hidden so
        # every chunk is lane-dense and padded hidden columns contribute zero.
        w1p = jnp.pad(w1c, ((0, 0), (0, H_pad - hidden)))
        b1p = jnp.pad(b1r, ((0, 0), (0, H_pad - hidden)))
        w2p = jnp.pad(w2c, ((0, H_pad - hidden), (0, 0)))
        # (If weight DMAs become exposed here, the two weight BlockSpecs could
        #  additionally use pipeline_mode=pl.Buffered(3); omitted for safety.)
        out = pl.pallas_call(
            mlp_kernel_chunked,
            out_shape=jax.ShapeDtypeStruct((M, out_chs), out_dtype),
            grid_spec=pltpu.PrefetchScalarGridSpec(
                num_scalar_prefetch=0,
                grid=(n_row_tiles, n_chunks),
                in_specs=[
                    pl.BlockSpec((tm, in_chs), lambda i, k: (i, 0)),
                    pl.BlockSpec((in_chs, hk), lambda i, k: (0, k)),
                    pl.BlockSpec((1, hk), lambda i, k: (0, k)),
                    pl.BlockSpec((hk, out_chs), lambda i, k: (k, 0)),
                    pl.BlockSpec((1, out_chs), lambda i, k: (0, 0)),
                ],
                out_specs=pl.BlockSpec((tm, out_chs), lambda i, k: (i, 0)),
                scratch_shapes=[pltpu.VMEM((tm, out_chs), jnp.float32)],
            ),
            compiler_params=pltpu.CompilerParams(
                dimension_semantics=("parallel", "arbitrary"),
                vmem_limit_bytes=vmem_limit,
            ),
            cost_estimate=cost,
        )(x2d, w1p, b1p, w2p, b2r)

    return out.reshape(B, N, out_chs)


def init_params(key, in_chs, hidden_chs, out_chs, dtype=jnp.float32):
    # Deterministic synthetic init mimicking nn.Linear's uniform(-1/sqrt(fan_in), ...)
    k1, k2, k3, k4 = jax.random.split(key, 4)
    lim1 = 1.0 / math.sqrt(in_chs)
    lim2 = 1.0 / math.sqrt(hidden_chs)
    # stored as (in, out) so the kernel computes x @ W (== x @ W_torch.T)
    w1 = jax.random.uniform(k1, (in_chs, hidden_chs), dtype, -lim1, lim1)
    b1 = jax.random.uniform(k2, (hidden_chs,), dtype, -lim1, lim1)
    w2 = jax.random.uniform(k3, (hidden_chs, out_chs), dtype, -lim2, lim2)
    b2 = jax.random.uniform(k4, (out_chs,), dtype, -lim2, lim2)
    return w1, b1, w2, b2


def _reference(x, w1, b1, w2, b2):
    B, N, C = x.shape
    h = x.reshape(B * N, C) @ w1 + b1
    h = 0.5 * h * (1.0 + jax.lax.erf(h / math.sqrt(2.0)))
    y = h @ w2 + b2
    return y.reshape(B, N, -1)


if __name__ == "__main__":
    key = jax.random.PRNGKey(0)
    kx, kp, kx2, kp2 = jax.random.split(key, 4)

    # Small shapes consistent with the module (out_chs defaults to in_chs).
    B, N, in_chs, hidden_chs, out_chs = 2, 8, 32, 64, 32
    x = jax.random.normal(kx, (B, N, in_chs), jnp.float32)
    w1, b1, w2, b2 = init_params(kp, in_chs, hidden_chs, out_chs)
    y_ref = _reference(x, w1, b1, w2, b2)

    # Default fast path: resident weights, bf16 MXU operands, f32 accumulation.
    y = mlp_block(x, w1, b1, w2, b2)
    jax.block_until_ready(y)
    assert y.shape == (B, N, out_chs)
    assert jnp.allclose(y, y_ref, atol=3e-2, rtol=3e-2), "mismatch (bf16 resident)"

    # f32 compute path for a tight numerical check of the same resident kernel.
    y32 = mlp_block(x, w1, b1, w2, b2, compute_dtype=jnp.float32)
    jax.block_until_ready(y32)
    assert jnp.allclose(y32, y_ref, atol=1e-5, rtol=1e-5), "mismatch (f32 resident)"

    # Chunked fallback path: forced hidden chunking + a partial last row tile.
    B2, N2, C2, H2, O2 = 3, 50, 48, 200, 48
    x2 = jax.random.normal(kx2, (B2, N2, C2), jnp.float32)
    p2 = init_params(kp2, C2, H2, O2)
    y2_ref = _reference(x2, *p2)
    y2_32 = mlp_block(x2, *p2, tm=64, hk=128, compute_dtype=jnp.float32)
    jax.block_until_ready(y2_32)
    assert y2_32.shape == (B2, N2, O2)
    assert jnp.allclose(y2_32, y2_ref, atol=1e-4, rtol=1e-4), "mismatch (f32 chunked)"

    y2 = mlp_block(x2, *p2, tm=64, hk=128)   # bf16 chunked
    jax.block_until_ready(y2)
    assert jnp.allclose(y2, y2_ref, atol=5e-2, rtol=5e-2), "mismatch (bf16 chunked)"

    print("KERNEL_OK")
</pallas_src>

<mosaic_0001>
module attributes {stable_mosaic.version = 11 : i64} {
  func.func @mlp_kernel_resident(%arg0: i32, %arg1: memref<8x32xf32, #tpu.memory_space<vmem>>, %arg2: memref<32x64xbf16, #tpu.memory_space<vmem>>, %arg3: memref<1x64xf32, #tpu.memory_space<vmem>>, %arg4: memref<64x32xbf16, #tpu.memory_space<vmem>>, %arg5: memref<1x32xf32, #tpu.memory_space<vmem>>, %arg6: memref<8x32xf32, #tpu.memory_space<vmem>>) attributes {dimension_semantics = [#tpu.dimension_semantics<parallel>], iteration_bounds = array<i64: 2>, scalar_prefetch = 0 : i64, scratch_operands = 0 : i64, tpu.core_type = #tpu.core_type<tc>, window_params = [{transform_indices = @transform_0, window_bounds = array<i64: 8, 32>}, {pipeline_mode = #tpu.pipeline_mode<synchronous>, transform_indices = @transform_1, window_bounds = array<i64: 32, 64>}, {pipeline_mode = #tpu.pipeline_mode<synchronous>, transform_indices = @transform_2, window_bounds = array<i64: 1, 64>}, {pipeline_mode = #tpu.pipeline_mode<synchronous>, transform_indices = @transform_3, window_bounds = array<i64: 64, 32>}, {pipeline_mode = #tpu.pipeline_mode<synchronous>, transform_indices = @transform_4, window_bounds = array<i64: 1, 32>}, {transform_indices = @transform_5, window_bounds = array<i64: 8, 32>}]} {
    %c0 = arith.constant 0 : index
    %c0_0 = arith.constant 0 : index
    %0 = vector.load %arg1[%c0, %c0_0] : memref<8x32xf32, #tpu.memory_space<vmem>>, vector<8x32xf32>
    %1 = arith.truncf %0 : vector<8x32xf32> to vector<8x32xbf16>
    %c0_1 = arith.constant 0 : index
    %c0_2 = arith.constant 0 : index
    %2 = vector.load %arg2[%c0_1, %c0_2] : memref<32x64xbf16, #tpu.memory_space<vmem>>, vector<32x64xbf16>
    %cst = arith.constant dense<0.000000e+00> : vector<8x64xf32>
    %3 = tpu.matmul %1, %2, %cst {dimension_numbers = #tpu.dot_dimension_numbers<[1], [0], [0], [1], [0, 0, 1, 1], [], []>} : vector<8x32xbf16>, vector<32x64xbf16>, vector<8x64xf32> -> vector<8x64xf32>
    %c0_3 = arith.constant 0 : index
    %c0_4 = arith.constant 0 : index
    %4 = vector.load %arg3[%c0_3, %c0_4] : memref<1x64xf32, #tpu.memory_space<vmem>>, vector<1x64xf32>
    %5 = vector.broadcast %4 : vector<1x64xf32> to vector<8x64xf32>
    %6 = arith.addf %3, %5 : vector<8x64xf32>
    %cst_5 = arith.constant 5.000000e-01 : f32
    %7 = vector.broadcast %cst_5 : f32 to vector<8x64xf32>
    %8 = arith.mulf %7, %6 : vector<8x64xf32>
    %cst_6 = arith.constant 0.707106769 : f32
    %9 = vector.broadcast %cst_6 : f32 to vector<8x64xf32>
    %10 = arith.mulf %6, %9 : vector<8x64xf32>
    %11 = math.erf %10 : vector<8x64xf32>
    %cst_7 = arith.constant 1.000000e+00 : f32
    %12 = vector.broadcast %cst_7 : f32 to vector<8x64xf32>
    %13 = arith.addf %12, %11 : vector<8x64xf32>
    %14 = arith.mulf %8, %13 : vector<8x64xf32>
    %15 = arith.truncf %14 : vector<8x64xf32> to vector<8x64xbf16>
    %c0_8 = arith.constant 0 : index
    %c0_9 = arith.constant 0 : index
    %16 = vector.load %arg4[%c0_8, %c0_9] : memref<64x32xbf16, #tpu.memory_space<vmem>>, vector<64x32xbf16>
    %cst_10 = arith.constant dense<0.000000e+00> : vector<8x32xf32>
    %17 = tpu.matmul %15, %16, %cst_10 {dimension_numbers = #tpu.dot_dimension_numbers<[1], [0], [0], [1], [0, 0, 1, 1], [], []>} : vector<8x64xbf16>, vector<64x32xbf16>, vector<8x32xf32> -> vector<8x32xf32>
    %c0_11 = arith.constant 0 : index
    %c0_12 = arith.constant 0 : index
    %18 = vector.load %arg5[%c0_11, %c0_12] : memref<1x32xf32, #tpu.memory_space<vmem>>, vector<1x32xf32>
    %19 = vector.broadcast %18 : vector<1x32xf32> to vector<8x32xf32>
    %20 = arith.addf %17, %19 : vector<8x32xf32>
    %c0_13 = arith.constant 0 : index
    %c0_14 = arith.constant 0 : index
    %21 = vector.load %arg6[%c0_13, %c0_14] : memref<8x32xf32, #tpu.memory_space<vmem>>, vector<8x32xf32>
    tpu.vector_store %arg6[%c0_13, %c0_14], %20 {strides = array<i32>} : memref<8x32xf32, #tpu.memory_space<vmem>>, vector<8x32xf32>,
    return
  }
  func.func @transform_0(%arg0: i32) -> (i32, i32) {
    %c0_i32 = arith.constant 0 : i32
    %c0_i32_0 = arith.constant 0 : i32
    return %arg0, %c0_i32 : i32, i32
  }
  func.func @transform_1(%arg0: i32) -> (i32, i32) {
    %c0_i32 = arith.constant 0 : i32
    %c0_i32_0 = arith.constant 0 : i32
    %c0_i32_1 = arith.constant 0 : i32
    return %c0_i32, %c0_i32_0 : i32, i32
  }
  func.func @transform_2(%arg0: i32) -> (i32, i32) {
    %c0_i32 = arith.constant 0 : i32
    %c0_i32_0 = arith.constant 0 : i32
    %c0_i32_1 = arith.constant 0 : i32
    return %c0_i32, %c0_i32_0 : i32, i32
  }
  func.func @transform_3(%arg0: i32) -> (i32, i32) {
    %c0_i32 = arith.constant 0 : i32
    %c0_i32_0 = arith.constant 0 : i32
    %c0_i32_1 = arith.constant 0 : i32
    return %c0_i32, %c0_i32_0 : i32, i32
  }
  func.func @transform_4(%arg0: i32) -> (i32, i32) {
    %c0_i32 = arith.constant 0 : i32
    %c0_i32_0 = arith.constant 0 : i32
    %c0_i32_1 = arith.constant 0 : i32
    return %c0_i32, %c0_i32_0 : i32, i32
  }
  func.func @transform_5(%arg0: i32) -> (i32, i32) {
    %c0_i32 = arith.constant 0 : i32
    %c0_i32_0 = arith.constant 0 : i32
    return %arg0, %c0_i32 : i32, i32
  }
}

</mosaic_0001>

<bundles_post_ra>
// kernel: mlp_block.1
= control target key start
LH: loop header
LB: loop body
LE: loop exit
PB: predicated region body
PF: predicated region fallthrough
CT: control target
= control target key end

     0   :  { %10 = vsyncpa [#allocation3], 0  ;;  %s725_s0 = inlined_call_operand.vmem [shape: f32[16,32], index: 0, kind: input, shape index: {}]   ;;  %s726_s1 = inlined_call_operand.vmem [shape: bf16[32,64], index: 1, kind: input, shape index: {}]   ;;  %s727_s2 = inlined_call_operand.vmem [shape: f32[1,64], index: 2, kind: input, shape index: {}]   ;;  %s728_s3 = inlined_call_operand.vmem [shape: bf16[64,32], index: 3, kind: input, shape index: {}]   ;;  %s729_s4 = inlined_call_operand.vmem [shape: f32[1,32], index: 4, kind: input, shape index: {}]   ;;  %s730_s5 = inlined_call_operand.hbm [shape: f32[16,32], index: 5, kind: output, shape index: {}]  }
   0x1   :  { %12 = vsyncpa [#allocation3 + $0x1], 0  ;;  %s614_s18 = smov 0   ;;  %s616_s19 = smov 0  }
   0x2   :  { %s618_s20 = smov 0   ;;  %s620_s21 = smov 0  }
   0x3 LB: > { %s635_s22 = sadd.s32 4294967295, %s582_s21   ;;  %s434_s23 = sadd.s32 4294967294, %s582_s21   ;;  %s582_s21 = sphi %s620_s21, %s736_s21   ;;  %s578_s20 = sphi %s618_s20, %s735_s20   ;;  %s574_s19 = sphi %s616_s19, %s734_s19   ;;  %s570_s18 = sphi %s614_s18, %s733_s18  }
   0x4   : > { %s639_s24 = sadd.s32 1, %s582_s21   ;;  %s135_s25 = sadd.s32 1, %s578_s20 }
   0x5   : > { %s132_s26 = ssub.s32 %s582_s21, %s639_s24  ;;  %p145_p0 = scmp.ne.s32.totalorder %s578_s20, %s574_s19 }
   0x6   : > { %p133_p1 = scmp.eq.s32.totalorder %s132_s26, 0  ;;  %p146_p2 = scmp.eq.s32.totalorder %s635_s22, 1 }
   0x7   : > { %p151_p3 = scmp.ne.s32.totalorder %s574_s19, %s570_s18  ;;  %p152_p4 = scmp.eq.s32.totalorder %s434_s23, 1 }
   0x8   : > { %s650_s27 = scalar_select %p133_p1, %s578_s20, %s135_s25  }
   0x9   : > { %p652_p5 = por %p146_p2, %p145_p0  ;;  %p656_p6 = por %p152_p4, %p151_p3 }
   0xa   : > { %p437_p7 = scmp.ge.s32.totalorder %s582_s21, 1  ;;  %p189_p8 = scmp.lt.s32.totalorder %s582_s21, 3 }
   0xc   : > { %p190_p9 = pnand %p437_p7, %p189_p8 }
   0xd   : > { %p216_p10 = scmp.lt.s32.totalorder (!%p190_p9), %s635_s22, 1  ;;  %s213_s8 = sand.u32 (!%p190_p9), 1, %s574_s19  }
   0xe   : > { %193 = sbr.rel (%p190_p9) target bundleno = 342 (0x156), region = 40  ;;  %s540_s7 = scalar_lea.hbm (!%p190_p9), %s730_s5, 16 }
  0x13   : > { %v472_v0 = vld [vmem:[%s726_s1 + $0x8] sm:$0xff]  ;;  %v471_v1 = vld [vmem:[%s726_s1] sm:$0xff]  ;;  %s217_s9 = scalar_select %p216_p10, %s635_s22, 1  ;;  %vm243_vm0 = vcmask 261120   ;;  %v476_v11 = vld [vmem:[%s728_s3 + $0x18] sm:$0xff]  ;;  %vm341_vm5 = vcmask 523264  }
  0x14   : > { %253 = vmatpush.bf16.msra.mxu0 %v472_v0  ;;  %v516_v4 = vld [vmem:[%s727_s2] ss:$0 sm:$0xff]  ;;  %349 = vmatpush.bf16.msra.mxu1 %v476_v11  ;;  %v475_v16 = vld [vmem:[%s728_s3 + $0x10] sm:$0xff]  ;;  %v474_v19 = vld [vmem:[%s728_s3 + $0x8] sm:$0xff] }
  0x15   : > { %s439_s10 = sshll.u32 %s217_s9, 3  ;;  %v473_v23 = vld [vmem:[%s728_s3] sm:$0xff]  ;;  %s468_s9 = sshll.u32 %s635_s22, 3 }
  0x16   : > { %s219_s13 = scalar_lea.vmem %s725_s0, %s439_s10  ;;  %s438_s10 = sshll.u32 %s213_s8, 3  ;;  %v517_v52 = vld [vmem:[%s729_s4] ss:$0 sm:$0xff] }
  0x17   : > { %v221_v2 = vld [vmem:[%s219_s13] sm:$0xff]  ;;  %s370_s13 = scalar_lea.hbm %s730_s5, %s468_s9  ;;  %s215_s16 = scalar_lea.vmem [#allocation2], %s438_s10 }
  0x18   : > { %254 = vmatpush.bf16.msra.mxu0 %v471_v1  ;;  %v222_v3 = vpack.c.bf16 %v221_v2, %v221_v2  ;;  %350 = vmatpush.bf16.msra.mxu1 %v475_v16  ;;  %s372_s17 = sshll.u32 %s215_s16, 4  ;;  %s374_s23 = sshll.u32 %s370_s13, 4  ;;  %s373_s17 = int_to_ptr.vmem [resolvable:$true] %s372_s17  ;;  %s375_s23 = int_to_ptr.hbm [resolvable:$true] %s374_s23 }
  0x19   : > { %s360_s22 = scalar_lea.sflag [#allocation3], %s213_s8  ;;  %s534_s25 = sshra.s32 %s375_s23, 4  ;;  %s535_s25 = int_to_ptr.hbm [resolvable:$true] %s534_s25 }
  0x1a   : > { %s536_s26 = scalar_lea.hbm %s535_s25, 8  ;;  %p541_p0 = scmp.lt.s32.totalorder %s535_s25, %s730_s5 }
  0x1b   : > { %448 = vmatmul.msk.bf16.vlgmr.msra.gmra.mxu0 %vm243_vm0, %v222_v3  ;;  %p537_p11 = scmp.ne.s32.totalorder %s535_s25, %s536_s26  ;;  %p542_p1 = scmp.lt.s32.totalorder %s540_s7, %s536_s26 }
  0x1c   : > { %351 = vmatpush.bf16.msra.mxu1 %v474_v19 }
  0x1d   : > { %p538_p12 = pnand %p537_p11, %p652_p5  ;;  %p543_p2 = por %p542_p1, %p541_p0 }
  0x1f   : > { %p539_p13 = pneg %p538_p12 }
  0x20   : > { %352 = vmatpush.bf16.msra.mxu1 %v473_v23 }
  0x21   : > { %p544_p3 = pnand %p543_p2, %p539_p13 }
  0x98   : > { %v256_v5 = vpop.f32.mrf.mxu0 }
  0x99   : > { %v257_v6 = vadd.f32 %v516_v4, %v256_v5 }
  0x9b   : > { %v261_v7 = vmul.f32 0.70710677, %v257_v6  ;;  %v260_v48 = vmul.f32 0.5, %v257_v6 }
  0x9d   : > { %v262_v8 = vmul.f32 %v261_v7, %v261_v7 }
  0x9f   : > { %v263_v9 = vmin.f32 %v262_v8, 16.0 }
  0xa0   : > { %v258_v10 = vpop.f32.mrf.mxu0 }
  0xa1   : > { %v264_v12 = vmul.f32 2.1237322e-06, %v263_v9  ;;  %v275_v13 = vmul.f32 3.8918573e-05, %v263_v9 }
  0xa3   : > { %v265_v14 = vadd.f32 0.00028619796, %v264_v12  ;;  %v276_v15 = vadd.f32 0.001143296, %v275_v13 }
  0xa5   : > { %v266_v17 = vmul.f32 %v265_v14, %v263_v9  ;;  %v277_v18 = vmul.f32 %v276_v15, %v263_v9 }
  0xa7   : > { %v278_v20 = vadd.f32 0.014752088, %v277_v18  ;;  %v267_v21 = vadd.f32 0.0036580483, %v266_v17 }
  0xa9   : > { %v279_v22 = vmul.f32 %v278_v20, %v263_v9  ;;  %v268_v25 = vmul.f32 %v267_v21, %v263_v9 }
  0xab   : > { %v280_v24 = vadd.f32 0.112945676, %v279_v22  ;;  %v269_v28 = vadd.f32 0.05243302, %v268_v25 }
  0xad   : > { %v281_v26 = vmul.f32 %v280_v24, %v263_v9  ;;  %v270_v31 = vmul.f32 %v269_v28, %v263_v9 }
  0xaf   : > { %v282_v27 = vadd.f32 0.4994258, %v281_v26  ;;  %v271_v32 = vadd.f32 0.18741608, %v270_v31 }
  0xb1   : > { %v283_v29 = vmul.f32 %v282_v27, %v263_v9  ;;  %v272_v34 = vmul.f32 %v271_v32, %v263_v9 }
  0xb3   : > { %v284_v30 = vadd.f32 1.0, %v283_v29  ;;  %v273_v38 = vadd.f32 1.1283791, %v272_v34 }
  0xb5   : > { %518 = vrcp.f32 %v284_v30  ;;  %v296_v37 = vand.u32 2147483648, %v284_v30  ;;  %v294_v40 = vand.u32 2147483647, %v284_v30  ;;  %vm290_vm2 = vweird.f32 %v284_v30 }
  0xb6   : > { %v274_v43 = vmul.f32 %v273_v38, %v261_v7 }
  0xb7   : > { %v297_v42 = vor.u32 1.1754944e-38, %v296_v37  ;;  %vm295_vm4 = vcmp.eq.f32.partialorder %v294_v40, 8.507059e+37 }
  0xbb   : > { %v519_v33 = vpop.eup %518 }
  0xbc   : > { %v286_v35 = vmul.f32 %v519_v33, %v284_v30  ;;  %vm291_vm1 = vweird.f32 %v519_v33 }
  0xbd   : > { %vm292_vm3 = vmor %vm290_vm2, %vm291_vm1 }
  0xbe   : > { %v287_v36 = vsub.f32 1.0, %v286_v35 }
  0xc0   : > { %v288_v39 = vmul.f32 %v519_v33, %v287_v36 }
  0xc2   : > { %v289_v41 = vadd.f32 %v519_v33, %v288_v39 }
  0xc4   : > { %v293_v44 = vsel %vm292_vm3, %v519_v33, %v289_v41 }
  0xc5   : > { %v298_v45 = vsel %vm295_vm4, %v297_v42, %v293_v44 }
  0xc6   : > { %v299_v46 = vmul.f32 %v298_v45, %v274_v43 }
  0xc8   : > { %v449_v47 = vclamps-f32 %v299_v46, 1.0 }
  0xca   : > { %v302_v49 = vadd.f32 1.0, %v449_v47 }
  0xcc   : > { %v303_v50 = vmul.f32 %v302_v49, %v260_v48 }
  0xce   : > { %v304_v51 = vpack.c.bf16 %v303_v50, %v303_v50 }
  0xd0   : > { %466 = vmatmul.msk.bf16.vlgmr.msra.gmra.mxu1 %vm341_vm5, %v304_v51 }
 0x14d   : > { %v354_v53 = vpop.f32.mrf.mxu1 }
 0x14e   : > { %v355_v54 = vadd.f32 %v517_v52, %v354_v53 }
 0x150   : > { %358 = vst.msk [vmem:[%s215_s16] sm:$0xff] %vm243_vm0, %v355_v54 }
 0x151   : > { %547 = shalt.err (!%p544_p3)
}
 0x152   : > { %477 = dma.vmem_to_hbm [thread:$0]  (%p652_p5), %s373_s17, 128, %s375_s23, %s360_s22  }
 0x155   : > { %v356_v55 = vpop.f32.mrf.mxu1 }
 0x156 PF: > { %p483_p4 = scmp.ge.s32.totalorder %s582_s21, 2  ;;  %s386_s8 = sand.u32 1, %s570_s18  }
 0x157   : > { %s387_s11 = scalar_lea.sflag [#allocation3], %s386_s8 }
 0x158   : > { %p480_p7 = pnand %p483_p4, %p656_p6 }
 0x15a   : > { %p481_p8 = pneg %p480_p7 }
 0x15c   : > { %565 = dma.done.wait (%p481_p8), %s387_s11, 128  }
 0x15d   : > { %567 = vsyncadd (%p481_p8), %s387_s11, 4294967168  ;;  %p15_p9 = scmp.ge.s32.totalorder %s639_s24, 4   ;;  %s733_s18 = smov %s574_s19 }
 0x15e   : > { %s734_s19 = smov %s578_s20  ;;  %s735_s20 = smov %s650_s27 }
 0x15f   : > { %s736_s21 = smov %s639_s24  ;;  %17 = sbr.rel (!%p15_p9) target bundleno = 3 (0x3), region = 75 }
 0x164   :  { %393 = vsyncpa [#allocation3], 1 }
 0x165   :  { %395 = vsyncpa [#allocation3 + $0x1], 1 }

</bundles_post_ra>
